<compile_context>
chip_gen: v7x
topology: tpu7x:2x2x1
jax: 0.10.0
libtpu: 0.0.40
codegen_flags: <defaults>
</compile_context>

<pallas_src>
import functools

import jax
import jax.numpy as jnp
from jax import lax
from jax.experimental import pallas as pl

# ---- module hyper-parameters (small, consistent with the forward) -----------
EMBED_SIZE = 32
NUM_HEADS = 4
HEAD_DIM = EMBED_SIZE // NUM_HEADS      # 8
SEQ_LEN = 8                             # query_len == key_len == value_len
BATCH = 4                               # independent examples, all in one kernel call
NEG_FILL = -1e20                        # torch masked_fill value
SCALE = 1.0 / (EMBED_SIZE ** 0.5)       # module divides by sqrt(embed_size)
OFF_BLOCK = -1e30                       # kills cross-(head,example) score lanes


def _mha_kernel(q_ref, k_ref, v_ref, bias_ref, wqkv_ref, wout_ref, o_ref, *, bs):
    """Whole batch in one invocation.

    q/k/v refs: (H*bs, Dh), row = h*bs + b*S + s.  bias_ref: (H*bs, H*bs) additive
    score bias.  wqkv_ref: (3*Dh, Dh) = [Wq; Wk; Wv].  wout_ref: (E+8, E) = [Wo; bo; 0].
    o_ref: (bs, E)."""
    # per-head projections — ONE MXU dot each over the head/example-stacked sublanes
    q = jnp.dot(q_ref[...], wqkv_ref[0:HEAD_DIM, :],
                preferred_element_type=jnp.float32)                        # (H*bs, Dh)
    k = jnp.dot(k_ref[...], wqkv_ref[HEAD_DIM:2 * HEAD_DIM, :],
                preferred_element_type=jnp.float32)
    v = jnp.dot(v_ref[...], wqkv_ref[2 * HEAD_DIM:3 * HEAD_DIM, :],
                preferred_element_type=jnp.float32)

    # all (head, example) score blocks in ONE MXU pass; contracting the last axes of
    # both operands avoids materializing a transposed copy of k (no XLU vxpose)
    e = lax.dot_general(q, k, (((1,), (1,)), ((), ())),
                        preferred_element_type=jnp.float32)                # (H*bs, H*bs)
    # additive bias: 0 valid / NEG_FILL*SCALE torch-masked / OFF_BLOCK cross-block
    e = e * SCALE + bias_ref[...]

    # numerically stable softmax over the key axis; off-block lanes exp() to exactly 0
    e = e - jnp.max(e, axis=-1, keepdims=True)
    p = jnp.exp(e)
    p = p / jnp.sum(p, axis=-1, keepdims=True)        # exact divide (EUP has slack)

    # attention @ values: the zeroed off-block lanes make this the batched P@V
    head_out = jnp.dot(p, v, preferred_element_type=jnp.float32)           # (H*bs, Dh)

    # fc_out folded per head: concat(heads) @ Wo == sum_h head_h @ Wo[h*Dh:(h+1)*Dh, :]
    # slices are static and sublane-aligned (bs and Dh are multiples of 8)
    acc = jnp.zeros((bs, EMBED_SIZE), jnp.float32)
    for h in range(NUM_HEADS):
        acc = acc + jnp.dot(head_out[h * bs:(h + 1) * bs, :],
                            wout_ref[h * HEAD_DIM:(h + 1) * HEAD_DIM, :],
                            preferred_element_type=jnp.float32)

    # TODO(synk): output last dim is E=32 (<128 lanes) -> masked vst; pack rows into a
    # lane-dense (bs*E/128, 128) slab only if B/S grow enough for writeback to matter.
    o_ref[...] = acc + wout_ref[EMBED_SIZE:EMBED_SIZE + 1, :]              # + fc_out bias


@jax.jit
def masked_self_attention(values, keys, query, mask, wv, wk, wq, wo, bo):
    """values/keys/query: (B, S, E); mask: (B, S, S) of 0/1. Returns (B, S, E).
    (The module's 2-D input path is B == 1 followed by a squeeze.)"""
    B, S, E = query.shape
    H, Dh = NUM_HEADS, HEAD_DIM
    bs = B * S

    # --- wrapper-side layout plumbing (cheap XLA ops; keeps cross-lane work out of
    # the kernel) -----------------------------------------------------------------
    def stack(x):  # (B, S, E) -> (H*B*S, Dh), row = h*(B*S) + b*S + s
        return x.reshape(B, S, H, Dh).transpose(2, 0, 1, 3).reshape(H * bs, Dh)

    q_st, k_st, v_st = stack(query), stack(keys), stack(values)

    # Additive score bias, built once from the torch-semantics mask:
    #   masked_fill(mask.transpose(-1,-2)==0, -1e20) then /sqrt(E)  ==  e*SCALE + bias.
    # Off-(head,example)-block lanes get OFF_BLOCK so they exp() to exactly 0.
    # (Only the degenerate "entire row masked" case differs slightly from torch's
    #  uniform distribution; normal rows are bit-equivalent after exp.)
    mask_t = jnp.swapaxes(mask, -1, -2)                                    # (B, S, S)
    in_blk = jnp.where(mask_t == 0, jnp.float32(NEG_FILL * SCALE), jnp.float32(0.0))
    in_blk = jnp.broadcast_to(in_blk[None], (H, B, S, S)).reshape(H * B, S, S)
    same_blk = jnp.eye(H * B, dtype=bool)[:, None, :, None]               # (HB,1,HB,1)
    bias = jnp.where(same_blk, in_blk[:, :, None, :],
                     jnp.float32(OFF_BLOCK)).reshape(H * bs, H * bs).astype(jnp.float32)

    # pack weights into two call-once slabs (fewer tiny DMA descriptors)
    w_qkv = jnp.concatenate([wq, wk, wv], axis=0)                          # (3*Dh, Dh)
    w_out = jnp.concatenate([wo, bo, jnp.zeros((7, E), jnp.float32)], axis=0)  # (E+8, E)

    # single grid step: everything fits VMEM, whole-array refs, no BlockSpec pipelining
    out2d = pl.pallas_call(
        functools.partial(_mha_kernel, bs=bs),
        out_shape=jax.ShapeDtypeStruct((bs, E), jnp.float32),
    )(q_st, k_st, v_st, bias, w_qkv, w_out)
    return out2d.reshape(B, S, E)


def _make_params(key):
    """Deterministic synthetic parameters (PyTorch-Linear fan-in init, pre-transposed)."""
    ks = jax.random.split(key, 5)

    def lin_w(k, fan_in, fan_out):
        bound = 1.0 / jnp.sqrt(fan_in)
        return jax.random.uniform(k, (fan_in, fan_out), jnp.float32, -bound, bound)

    wv = lin_w(ks[0], HEAD_DIM, HEAD_DIM)
    wk = lin_w(ks[1], HEAD_DIM, HEAD_DIM)
    wq = lin_w(ks[2], HEAD_DIM, HEAD_DIM)
    wo = lin_w(ks[3], EMBED_SIZE, EMBED_SIZE)
    bound = 1.0 / jnp.sqrt(EMBED_SIZE)
    bo = jax.random.uniform(ks[4], (1, EMBED_SIZE), jnp.float32, -bound, bound)
    return wv, wk, wq, wo, bo


def _reference(values, keys, query, mask, wv, wk, wq, wo, bo):
    """Plain-JAX reference mirroring the PyTorch forward (per example), for a check."""
    B, S, E = query.shape
    v = values.reshape(B, S, NUM_HEADS, HEAD_DIM) @ wv    # shared per-head linear, no bias
    k = keys.reshape(B, S, NUM_HEADS, HEAD_DIM) @ wk
    q = query.reshape(B, S, NUM_HEADS, HEAD_DIM) @ wq
    energy = jnp.einsum('bqhd,bkhd->bhqk', q, k)
    mask_t = jnp.swapaxes(mask, -1, -2)[:, None, :, :]    # mask.transpose(-1,-2), bcast heads
    energy = jnp.where(mask_t == 0, NEG_FILL, energy)
    attention = jax.nn.softmax(energy / (EMBED_SIZE ** 0.5), axis=-1)
    out = jnp.einsum('bhqk,bkhd->bqhd', attention, v).reshape(B, S, NUM_HEADS * HEAD_DIM)
    return out @ wo + bo


if __name__ == "__main__":
    key = jax.random.PRNGKey(0)
    kv, kk, kq, kp = jax.random.split(key, 4)
    values = jax.random.normal(kv, (BATCH, SEQ_LEN, EMBED_SIZE), jnp.float32)
    keys = jax.random.normal(kk, (BATCH, SEQ_LEN, EMBED_SIZE), jnp.float32)
    query = jax.random.normal(kq, (BATCH, SEQ_LEN, EMBED_SIZE), jnp.float32)
    # 0/1 mask per example (lower-triangular); module masks where mask.transpose(-1,-2)==0
    mask = jnp.broadcast_to(jnp.tril(jnp.ones((SEQ_LEN, SEQ_LEN), jnp.float32)),
                            (BATCH, SEQ_LEN, SEQ_LEN))
    params = _make_params(kp)

    out = masked_self_attention(values, keys, query, mask, *params)
    out = jax.block_until_ready(out)

    ref = _reference(values, keys, query, mask, *params)
    assert out.shape == (BATCH, SEQ_LEN, EMBED_SIZE)
    # tolerance covers XLA's default (reduced-precision) matmul path in the reference
    assert jnp.allclose(out, ref, atol=2e-3, rtol=2e-3), "mismatch vs JAX reference"

    print("KERNEL_OK")
</pallas_src>

<mosaic_0001>
module attributes {stable_mosaic.version = 11 : i64} {
  func.func @_mha_kernel(%arg0: memref<128x8xf32, #tpu.memory_space<vmem>>, %arg1: memref<128x8xf32, #tpu.memory_space<vmem>>, %arg2: memref<128x8xf32, #tpu.memory_space<vmem>>, %arg3: memref<128x128xf32, #tpu.memory_space<vmem>>, %arg4: memref<24x8xf32, #tpu.memory_space<vmem>>, %arg5: memref<40x32xf32, #tpu.memory_space<vmem>>, %arg6: memref<32x32xf32, #tpu.memory_space<vmem>>) attributes {dimension_semantics = [], scalar_prefetch = 0 : i64, scratch_operands = 0 : i64, tpu.core_type = #tpu.core_type<tc>} {
    %c0 = arith.constant 0 : index
    %c0_0 = arith.constant 0 : index
    %0 = vector.load %arg0[%c0, %c0_0] : memref<128x8xf32, #tpu.memory_space<vmem>>, vector<128x8xf32>
    %c0_1 = arith.constant 0 : index
    %c0_2 = arith.constant 0 : index
    %1 = vector.load %arg4[%c0_1, %c0_2] : memref<24x8xf32, #tpu.memory_space<vmem>>, vector<8x8xf32>
    %cst = arith.constant dense<0.000000e+00> : vector<128x8xf32>
    %2 = tpu.matmul %0, %1, %cst {dimension_numbers = #tpu.dot_dimension_numbers<[1], [0], [0], [1], [0, 0, 1, 1], [], []>} : vector<128x8xf32>, vector<8x8xf32>, vector<128x8xf32> -> vector<128x8xf32>
    %c0_3 = arith.constant 0 : index
    %c0_4 = arith.constant 0 : index
    %3 = vector.load %arg1[%c0_3, %c0_4] : memref<128x8xf32, #tpu.memory_space<vmem>>, vector<128x8xf32>
    %c8 = arith.constant 8 : index
    %c0_5 = arith.constant 0 : index
    %4 = vector.load %arg4[%c8, %c0_5] : memref<24x8xf32, #tpu.memory_space<vmem>>, vector<8x8xf32>
    %cst_6 = arith.constant dense<0.000000e+00> : vector<128x8xf32>
    %5 = tpu.matmul %3, %4, %cst_6 {dimension_numbers = #tpu.dot_dimension_numbers<[1], [0], [0], [1], [0, 0, 1, 1], [], []>} : vector<128x8xf32>, vector<8x8xf32>, vector<128x8xf32> -> vector<128x8xf32>
    %c0_7 = arith.constant 0 : index
    %c0_8 = arith.constant 0 : index
    %6 = vector.load %arg2[%c0_7, %c0_8] : memref<128x8xf32, #tpu.memory_space<vmem>>, vector<128x8xf32>
    %c16 = arith.constant 16 : index
    %c0_9 = arith.constant 0 : index
    %7 = vector.load %arg4[%c16, %c0_9] : memref<24x8xf32, #tpu.memory_space<vmem>>, vector<8x8xf32>
    %cst_10 = arith.constant dense<0.000000e+00> : vector<128x8xf32>
    %8 = tpu.matmul %6, %7, %cst_10 {dimension_numbers = #tpu.dot_dimension_numbers<[1], [0], [0], [1], [0, 0, 1, 1], [], []>} : vector<128x8xf32>, vector<8x8xf32>, vector<128x8xf32> -> vector<128x8xf32>
    %cst_11 = arith.constant dense<0.000000e+00> : vector<128x128xf32>
    %9 = tpu.matmul %2, %5, %cst_11 {dimension_numbers = #tpu.dot_dimension_numbers<[1], [1], [0], [0], [0, 0, 1, 0], [], []>} : vector<128x8xf32>, vector<128x8xf32>, vector<128x128xf32> -> vector<128x128xf32>
    %cst_12 = arith.constant 0.176776692 : f32
    %10 = vector.broadcast %cst_12 : f32 to vector<128x128xf32>
    %11 = arith.mulf %9, %10 : vector<128x128xf32>
    %c0_13 = arith.constant 0 : index
    %c0_14 = arith.constant 0 : index
    %12 = vector.load %arg3[%c0_13, %c0_14] : memref<128x128xf32, #tpu.memory_space<vmem>>, vector<128x128xf32>
    %13 = arith.addf %11, %12 : vector<128x128xf32>
    %cst_15 = arith.constant dense<0xFF800000> : vector<128xf32>
    %14 = vector.multi_reduction <maximumf>, %13, %cst_15 [1] : vector<128x128xf32> to vector<128xf32>
    %15 = vector.shape_cast %14 : vector<128xf32> to vector<128x1xf32>
    %16 = vector.broadcast %15 : vector<128x1xf32> to vector<128x128xf32>
    %17 = arith.subf %13, %16 : vector<128x128xf32>
    %18 = math.exp %17 : vector<128x128xf32>
    %cst_16 = arith.constant dense<0.000000e+00> : vector<128xf32>
    %19 = vector.multi_reduction <add>, %18, %cst_16 [1] : vector<128x128xf32> to vector<128xf32>
    %20 = vector.shape_cast %19 : vector<128xf32> to vector<128x1xf32>
    %21 = vector.broadcast %20 : vector<128x1xf32> to vector<128x128xf32>
    %22 = arith.divf %18, %21 : vector<128x128xf32>
    %cst_17 = arith.constant dense<0.000000e+00> : vector<128x8xf32>
    %23 = tpu.matmul %22, %8, %cst_17 {dimension_numbers = #tpu.dot_dimension_numbers<[1], [0], [0], [1], [0, 0, 1, 1], [], []>} : vector<128x128xf32>, vector<128x8xf32>, vector<128x8xf32> -> vector<128x8xf32>
    %cst_18 = arith.constant 0.000000e+00 : f32
    %24 = vector.broadcast %cst_18 : f32 to vector<32x32xf32>
    %25 = vector.extract_strided_slice %23 {offsets = [0, 0], sizes = [32, 8], strides = [1, 1]} : vector<128x8xf32> to vector<32x8xf32>
    %c0_19 = arith.constant 0 : index
    %c0_20 = arith.constant 0 : index
    %26 = vector.load %arg5[%c0_19, %c0_20] : memref<40x32xf32, #tpu.memory_space<vmem>>, vector<8x32xf32>
    %cst_21 = arith.constant dense<0.000000e+00> : vector<32x32xf32>
    %27 = tpu.matmul %25, %26, %cst_21 {dimension_numbers = #tpu.dot_dimension_numbers<[1], [0], [0], [1], [0, 0, 1, 1], [], []>} : vector<32x8xf32>, vector<8x32xf32>, vector<32x32xf32> -> vector<32x32xf32>
    %28 = arith.addf %24, %27 : vector<32x32xf32>
    %29 = vector.extract_strided_slice %23 {offsets = [32, 0], sizes = [32, 8], strides = [1, 1]} : vector<128x8xf32> to vector<32x8xf32>
    %c8_22 = arith.constant 8 : index
    %c0_23 = arith.constant 0 : index
    %30 = vector.load %arg5[%c8_22, %c0_23] : memref<40x32xf32, #tpu.memory_space<vmem>>, vector<8x32xf32>
    %cst_24 = arith.constant dense<0.000000e+00> : vector<32x32xf32>
    %31 = tpu.matmul %29, %30, %cst_24 {dimension_numbers = #tpu.dot_dimension_numbers<[1], [0], [0], [1], [0, 0, 1, 1], [], []>} : vector<32x8xf32>, vector<8x32xf32>, vector<32x32xf32> -> vector<32x32xf32>
    %32 = arith.addf %28, %31 : vector<32x32xf32>
    %33 = vector.extract_strided_slice %23 {offsets = [64, 0], sizes = [32, 8], strides = [1, 1]} : vector<128x8xf32> to vector<32x8xf32>
    %c16_25 = arith.constant 16 : index
    %c0_26 = arith.constant 0 : index
    %34 = vector.load %arg5[%c16_25, %c0_26] : memref<40x32xf32, #tpu.memory_space<vmem>>, vector<8x32xf32>
    %cst_27 = arith.constant dense<0.000000e+00> : vector<32x32xf32>
    %35 = tpu.matmul %33, %34, %cst_27 {dimension_numbers = #tpu.dot_dimension_numbers<[1], [0], [0], [1], [0, 0, 1, 1], [], []>} : vector<32x8xf32>, vector<8x32xf32>, vector<32x32xf32> -> vector<32x32xf32>
    %36 = arith.addf %32, %35 : vector<32x32xf32>
    %37 = vector.extract_strided_slice %23 {offsets = [96, 0], sizes = [32, 8], strides = [1, 1]} : vector<128x8xf32> to vector<32x8xf32>
    %c24 = arith.constant 24 : index
    %c0_28 = arith.constant 0 : index
    %38 = vector.load %arg5[%c24, %c0_28] : memref<40x32xf32, #tpu.memory_space<vmem>>, vector<8x32xf32>
    %cst_29 = arith.constant dense<0.000000e+00> : vector<32x32xf32>
    %39 = tpu.matmul %37, %38, %cst_29 {dimension_numbers = #tpu.dot_dimension_numbers<[1], [0], [0], [1], [0, 0, 1, 1], [], []>} : vector<32x8xf32>, vector<8x32xf32>, vector<32x32xf32> -> vector<32x32xf32>
    %40 = arith.addf %36, %39 : vector<32x32xf32>
    %c32 = arith.constant 32 : index
    %c0_30 = arith.constant 0 : index
    %41 = vector.load %arg5[%c32, %c0_30] : memref<40x32xf32, #tpu.memory_space<vmem>>, vector<1x32xf32>
    %42 = vector.broadcast %41 : vector<1x32xf32> to vector<32x32xf32>
    %43 = arith.addf %40, %42 : vector<32x32xf32>
    %c0_31 = arith.constant 0 : index
    %c0_32 = arith.constant 0 : index
    %44 = vector.load %arg6[%c0_31, %c0_32] : memref<32x32xf32, #tpu.memory_space<vmem>>, vector<32x32xf32>
    tpu.vector_store %arg6[%c0_31, %c0_32], %43 {strides = array<i32>} : memref<32x32xf32, #tpu.memory_space<vmem>>, vector<32x32xf32>,
    return
  }
}

</mosaic_0001>

<bundles_post_ra>
// kernel: masked_self_attention.1
= control target key start
LH: loop header
LB: loop body
LE: loop exit
PB: predicated region body
PF: predicated region fallthrough
CT: control target
= control target key end

     0   :  { %vm41_vm0 = vcmask 64512   ;;  %s2829_s0 = inlined_call_operand.vmem [shape: f32[128,8], index: 0, kind: input, shape index: {}]   ;;  %s2830_s1 = inlined_call_operand.vmem [shape: f32[128,8], index: 1, kind: input, shape index: {}]   ;;  %s2831_s2 = inlined_call_operand.vmem [shape: f32[128,8], index: 2, kind: input, shape index: {}]   ;;  %s2832_s3 = inlined_call_operand.vmem [shape: f32[128,128], index: 3, kind: input, shape index: {}]   ;;  %s2833_s4 = inlined_call_operand.vmem [shape: f32[24,8], index: 4, kind: input, shape index: {}]   ;;  %s2834_s5 = inlined_call_operand.vmem [shape: f32[40,32], index: 5, kind: input, shape index: {}]   ;;  %s2835_s6 = inlined_call_operand.hbm [shape: f32[32,32], index: 6, kind: output, shape index: {}]  }
   0x1   :  { %v40_v0 = vld [vmem:[%s2833_s4] sm:$0xff]  ;;  %v33_v2 = vld [vmem:[%s2829_s0 + $0x48] sm:$0xff]  ;;  %v34_v4 = vld [vmem:[%s2829_s0 + $0x50] sm:$0xff] }
   0x2   :  { %v32_v1 = vld [vmem:[%s2829_s0 + $0x40] sm:$0xff]  ;;  %2197 = vmatprep.subr.mxu1 %v40_v0  ;;  %v251_v3 = vld [vmem:[%s2833_s4 + $0x8] sm:$0xff]  ;;  %1895 = vmatprep.subr.mxu0 %v40_v0  ;;  %v35_v5 = vld [vmem:[%s2829_s0 + $0x58] sm:$0xff] }
   0x3   :  { %1909 = vmatprep.mubr.msk.f32.mxu1 %vm41_vm0, %v32_v1  ;;  %2198 = vmatpush3.msra.mxu1 %v40_v0  ;;  %v36_v6 = vld [vmem:[%s2829_s0 + $0x60] sm:$0xff]  ;;  %v37_v7 = vld [vmem:[%s2829_s0 + $0x68] sm:$0xff]  ;;  %v38_v9 = vld [vmem:[%s2829_s0 + $0x70] sm:$0xff] }
   0x4   :  { %1910 = vmatmul.mubr.msk.f32.vlgmr.msra.gmra.mrb[0].mxu1 %vm41_vm0, %v33_v2  ;;  %1921 = vmatprep.subr.mxu1 %v251_v3  ;;  %v24_v8 = vld [vmem:[%s2829_s0] sm:$0xff]  ;;  %v25_v10 = vld [vmem:[%s2829_s0 + $0x8] sm:$0xff]  ;;  %v26_v11 = vld [vmem:[%s2829_s0 + $0x10] sm:$0xff] }
   0x5   :  { %1922 = vmatpush3.msra.mxu1 %v251_v3  ;;  %1912 = vmatprep.mubr.msk.f32.mxu1 %vm41_vm0, %v34_v4  ;;  %v27_v12 = vld [vmem:[%s2829_s0 + $0x18] sm:$0xff] }
   0x6   :  { %1896 = vmatpush3.msra.mxu0 %v40_v0  ;;  %1897 = vmatprep.mubr.msk.f32.mxu0 %vm41_vm0, %v24_v8 }
   0x7   :  { %1898 = vmatmul.mubr.msk.f32.vlgmr.msra.gmra.mrb[0].mxu0 %vm41_vm0, %v25_v10 }
   0x8   :  { %1913 = vmatmul.mubr.msk.f32.gmra.mrb[2].mxu1 %vm41_vm0, %v35_v5  ;;  %1900 = vmatprep.mubr.msk.f32.mxu0 %vm41_vm0, %v26_v11 }
   0x9   :  { %1915 = vmatprep.mubr.msk.f32.mxu1 %vm41_vm0, %v36_v6 }
   0xc   :  { %1916 = vmatmul.mubr.msk.f32.gmra.mrb[4].mxu1 %vm41_vm0, %v37_v7 }
   0xd   :  { %11 = vsyncpa [#allocation3], 0  ;;  %1918 = vmatprep.mubr.msk.f32.mxu1 %vm41_vm0, %v38_v9  ;;  %v39_v13 = vld [vmem:[%s2829_s0 + $0x78] sm:$0xff]  ;;  %v28_v14 = vld [vmem:[%s2829_s0 + $0x20] sm:$0xff]  ;;  %1901 = vmatmul.mubr.msk.f32.gmra.mrb[2].mxu0 %vm41_vm0, %v27_v12  ;;  %vm1642_vm2 = vcmask 261120   ;;  %s2302_s8 = smov [#allocation2]  }
   0xe   :  { %v235_v15 = vld [vmem:[%s2830_s1] sm:$0xff]  ;;  %1903 = vmatprep.mubr.msk.f32.mxu0 %vm41_vm0, %v28_v14  ;;  %v29_v16 = vld [vmem:[%s2829_s0 + $0x28] sm:$0xff]  ;;  %v30_v18 = vld [vmem:[%s2829_s0 + $0x30] sm:$0xff]  ;;  %s1652_s9 = sshll.u32 %s2302_s8, 4  ;;  %s1653_s9 = int_to_ptr.vmem [resolvable:$true] %s1652_s9 }
   0xf   :  { %v236_v17 = vld [vmem:[%s2830_s1 + $0x8] sm:$0xff]  ;;  %v237_v19 = vld [vmem:[%s2830_s1 + $0x10] sm:$0xff]  ;;  %v31_v20 = vld [vmem:[%s2829_s0 + $0x38] sm:$0xff]  ;;  %s2278_s10 = scalar_lea.vmem %s1653_s9, 512  ;;  %p2283_p1 = scmp.lt.s32.totalorder %s1653_s9, %s1653_s9 }
  0x10   :  { %1919 = vmatmul.mubr.msk.f32.gmra.mrb[6].mxu1 %vm41_vm0, %v39_v13  ;;  %v238_v21 = vld [vmem:[%s2830_s1 + $0x18] sm:$0xff]  ;;  %v239_v22 = vld [vmem:[%s2830_s1 + $0x20] sm:$0xff]  ;;  %v240_v23 = vld [vmem:[%s2830_s1 + $0x28] sm:$0xff]  ;;  %p2279_p0 = scmp.ne.s32.totalorder %s1653_s9, %s2278_s10  ;;  %p2284_p2 = scmp.lt.s32.totalorder %s2278_s10, %s2278_s10 }
  0x11   :  { %1923 = vmatprep.mubr.msk.f32.mxu1 %vm41_vm0, %v235_v15  ;;  %1904 = vmatmul.mubr.msk.f32.gmra.mrb[4].mxu0 %vm41_vm0, %v29_v16  ;;  %v241_v24 = vld [vmem:[%s2830_s1 + $0x30] sm:$0xff]  ;;  %v242_v25 = vld [vmem:[%s2830_s1 + $0x38] sm:$0xff]  ;;  %v243_v26 = vld [vmem:[%s2830_s1 + $0x40] sm:$0xff] }
  0x12   :  { %1906 = vmatprep.mubr.msk.f32.mxu0 %vm41_vm0, %v30_v18  ;;  %v244_v27 = vld [vmem:[%s2830_s1 + $0x48] sm:$0xff]  ;;  %v245_v28 = vld [vmem:[%s2830_s1 + $0x50] sm:$0xff]  ;;  %v246_v29 = vld [vmem:[%s2830_s1 + $0x58] sm:$0xff]  ;;  %p2285_p3 = por %p2284_p2, %p2283_p1 }
  0x13   :  { %v247_v30 = vld [vmem:[%s2830_s1 + $0x60] sm:$0xff]  ;;  %v248_v31 = vld [vmem:[%s2830_s1 + $0x68] sm:$0xff]  ;;  %v249_v32 = vld [vmem:[%s2830_s1 + $0x70] sm:$0xff] }
  0x14   :  { %1924 = vmatmul.mubr.msk.f32.vlgmr.msra.gmra.mrb[8].mxu1 %vm41_vm0, %v236_v17  ;;  %v250_v33 = vld [vmem:[%s2830_s1 + $0x78] sm:$0xff]  ;;  %vm2487_vm1 = vmpackc.low %vm41_vm0, %vm41_vm0  ;;  %v461_v11 = vld [vmem:[%s2833_s4 + $0x10] sm:$0xff]  ;;  %p2286_p4 = pnand %p2285_p3, %p2279_p0 }
  0x15   :  { %1926 = vmatprep.mubr.msk.f32.mxu1 %vm41_vm0, %v237_v19  ;;  %1907 = vmatmul.mubr.msk.f32.gmra.mrb[6].mxu0 %vm41_vm0, %v31_v20  ;;  %v445_v12 = vld [vmem:[%s2831_s2] sm:$0xff]  ;;  %v446_v13 = vld [vmem:[%s2831_s2 + $0x8] sm:$0xff]  ;;  %v447_v14 = vld [vmem:[%s2831_s2 + $0x10] sm:$0xff] }
  0x16   :  { %1947 = vmatprep.subr.mxu0 %v461_v11  ;;  %1949 = vmatprep.mubr.msk.f32.mxu0 %vm41_vm0, %v445_v12  ;;  %v448_v15 = vld [vmem:[%s2831_s2 + $0x18] sm:$0xff]  ;;  %v449_v16 = vld [vmem:[%s2831_s2 + $0x20] sm:$0xff]  ;;  %v450_v17 = vld [vmem:[%s2831_s2 + $0x28] sm:$0xff] }
  0x17   :  { %1948 = vmatpush3.msra.mxu0 %v461_v11  ;;  %v451_v18 = vld [vmem:[%s2831_s2 + $0x30] sm:$0xff]  ;;  %v452_v19 = vld [vmem:[%s2831_s2 + $0x38] sm:$0xff]  ;;  %v453_v20 = vld [vmem:[%s2831_s2 + $0x40] sm:$0xff] }
  0x18   :  { %1927 = vmatmul.mubr.msk.f32.gmra.mrb[10].mxu1 %vm41_vm0, %v238_v21  ;;  %v454_v21 = vld [vmem:[%s2831_s2 + $0x48] sm:$0xff]  ;;  %v923_v12 = vld [vmem:[%s2832_s3 + $0x58] sm:$0xff] }
  0x19   :  { %1929 = vmatprep.mubr.msk.f32.mxu1 %vm41_vm0, %v239_v22  ;;  %1950 = vmatmul.mubr.msk.f32.vlgmr.msra.gmra.mrb[8].mxu0 %vm41_vm0, %v446_v13  ;;  %v455_v22 = vld [vmem:[%s2831_s2 + $0x50] sm:$0xff]  ;;  %v924_v13 = vld [vmem:[%s2832_s3 + $0x60] sm:$0xff] }
  0x1a   :  { %1952 = vmatprep.mubr.msk.f32.mxu0 %vm41_vm0, %v447_v14 }
  0x1c   :  { %1930 = vmatmul.mubr.msk.f32.gmra.mrb[12].mxu1 %vm41_vm0, %v240_v23  ;;  %v456_v23 = vld [vmem:[%s2831_s2 + $0x58] sm:$0xff] }
  0x1d   :  { %1932 = vmatprep.mubr.msk.f32.mxu1 %vm41_vm0, %v241_v24  ;;  %1953 = vmatmul.mubr.msk.f32.gmra.mrb[10].mxu0 %vm41_vm0, %v448_v15  ;;  %v457_v24 = vld [vmem:[%s2831_s2 + $0x60] sm:$0xff] }
  0x1e   :  { %1955 = vmatprep.mubr.msk.f32.mxu0 %vm41_vm0, %v449_v16 }
  0x20   :  { %1933 = vmatmul.mubr.msk.f32.gmra.mrb[14].mxu1 %vm41_vm0, %v242_v25  ;;  %v458_v25 = vld [vmem:[%s2831_s2 + $0x68] sm:$0xff] }
  0x21   :  { %1935 = vmatprep.mubr.msk.f32.mxu1 %vm41_vm0, %v243_v26  ;;  %1956 = vmatmul.mubr.msk.f32.gmra.mrb[12].mxu0 %vm41_vm0, %v450_v17  ;;  %v459_v26 = vld [vmem:[%s2831_s2 + $0x70] sm:$0xff] }
  0x22   :  { %1958 = vmatprep.mubr.msk.f32.mxu0 %vm41_vm0, %v451_v18 }
  0x24   :  { %1936 = vmatmul.mubr.msk.f32.gmra.mrb[16].mxu1 %vm41_vm0, %v244_v27  ;;  %v460_v27 = vld [vmem:[%s2831_s2 + $0x78] sm:$0xff] }
  0x25   :  { %1938 = vmatprep.mubr.msk.f32.mxu1 %vm41_vm0, %v245_v28  ;;  %1959 = vmatmul.mubr.msk.f32.gmra.mrb[14].mxu0 %vm41_vm0, %v452_v19 }
  0x26   :  { %1961 = vmatprep.mubr.msk.f32.mxu0 %vm41_vm0, %v453_v20  ;;  %v925_v20 = vld [vmem:[%s2832_s3 + $0x68] sm:$0xff] }
  0x28   :  { %1939 = vmatmul.mubr.msk.f32.gmra.mrb[18].mxu1 %vm41_vm0, %v246_v29 }
  0x29   :  { %1941 = vmatprep.mubr.msk.f32.mxu1 %vm41_vm0, %v247_v30  ;;  %1962 = vmatmul.mubr.msk.f32.gmra.mrb[16].mxu0 %vm41_vm0, %v454_v21  ;;  %v912_v30 = vld [vmem:[%s2832_s3] sm:$0xff]  ;;  %v926_v21 = vld [vmem:[%s2832_s3 + $0x70] sm:$0xff] }
  0x2a   :  { %1964 = vmatprep.mubr.msk.f32.mxu0 %vm41_vm0, %v455_v22 }
  0x2c   :  { %1942 = vmatmul.mubr.msk.f32.gmra.mrb[20].mxu1 %vm41_vm0, %v248_v31 }
  0x2d   :  { %1944 = vmatprep.mubr.msk.f32.mxu1 %vm41_vm0, %v249_v32  ;;  %1965 = vmatmul.mubr.msk.f32.gmra.mrb[18].mxu0 %vm41_vm0, %v456_v23 }
  0x2e   :  { %1967 = vmatprep.mubr.msk.f32.mxu0 %vm41_vm0, %v457_v24 }
  0x30   :  { %1945 = vmatmul.mubr.msk.f32.gmra.mrb[22].mxu1 %vm41_vm0, %v250_v33 }
  0x31   :  { %1968 = vmatmul.mubr.msk.f32.gmra.mrb[20].mxu0 %vm41_vm0, %v458_v25 }
  0x32   :  { %1970 = vmatprep.mubr.msk.f32.mxu0 %vm41_vm0, %v459_v26  ;;  %v927_v26 = vld [vmem:[%s2832_s3 + $0x78] sm:$0xff] }
  0x35   :  { %1971 = vmatmul.mubr.msk.f32.gmra.mrb[22].mxu0 %vm41_vm0, %v460_v27 }
  0xd7   :  { %v2474_v34 = vpop.f32.mrb[0].mxu1 }
  0xd8   :  { %v2476_v35 = vpop.f32.mrb[1].mxu1 }
  0xda   :  { %v1899_v38 = vpop.f32.mrb[0].mxu0 }
  0xdb   :  { %v2478_v36 = vpop.f32.mrb[2].mxu1  ;;  %v156_v40 = vpop.f32.mrb[1].mxu0 }
  0xdc   :  { %v2480_v37 = vpop.f32.mrb[3].mxu1  ;;  %2005 = vmatprep.mubr.msk.f32.mxu1 %vm41_vm0, %v156_v40 }
  0xdf   :  { %v2482_v39 = vpop.f32.mrb[4].mxu1 }
  0xe0   :  { %v216_v41 = vpop.f32.mrb[5].mxu1  ;;  %v1902_v42 = vpop.f32.mrb[2].mxu0 }
  0xe1   :  { %v166_v44 = vpop.f32.mrb[3].mxu0 }
  0xe3   :  { %v1920_v43 = vpop.f32.mrb[6].mxu1 }
  0xe4   :  { %v226_v45 = vpop.f32.mrb[7].mxu1  ;;  %v1905_v46 = vpop.f32.mrb[4].mxu0 }
  0xe5   :  { %v176_v48 = vpop.f32.mrb[5].mxu0 }
  0xe7   :  { %v1925_v47 = vpop.f32.mrb[8].mxu1 }
  0xe8   :  { %v366_v49 = vpop.f32.mrb[9].mxu1  ;;  %v1908_v52 = vpop.f32.mrb[6].mxu0 }
  0xe9   :  { %v2117_v51 = vpack.c.bf16 %v1925_v47, %v366_v49  ;;  %v186_v54 = vpop.f32.mrb[7].mxu0 }
  0xeb   :  { %2119 = vmatprep.subr.msk.bf16.mxu1 %vm2487_vm1, %v2117_v51  ;;  %v1928_v53 = vpop.f32.mrb[10].mxu1 }
  0xec   :  { %2122 = vmatpush3.bf16.xpose.msk.msra.mxu1 %vm2487_vm1, %v2117_v51  ;;  %v376_v55 = vpop.f32.mrb[11].mxu1 }
  0xed   :  { %v2123_v56 = vpack.c.bf16 %v1928_v53, %v376_v55  ;;  %v918_v53 = vld [vmem:[%s2832_s3 + $0x30] sm:$0xff] }
  0xef   :  { %2125 = vmatprep.subr.msk.bf16.mxu1 %vm2487_vm1, %v2123_v56  ;;  %v1931_v57 = vpop.f32.mrb[12].mxu1 }
  0xf0   :  { %v386_v58 = vpop.f32.mrb[13].mxu1 }
  0xf1   :  { %v2129_v59 = vpack.c.bf16 %v1931_v57, %v386_v58 }
  0xf3   :  { %v1934_v60 = vpop.f32.mrb[14].mxu1 }
  0xf4   :  { %2128 = vmatpush3.bf16.xpose.msk.msra.mxu1 %vm2487_vm1, %v2123_v56  ;;  %v396_v61 = vpop.f32.mrb[15].mxu1 }
  0xf5   :  { %2131 = vmatprep.subr.msk.bf16.mxu1 %vm2487_vm1, %v2129_v59  ;;  %v2135_v62 = vpack.c.bf16 %v1934_v60, %v396_v61  ;;  %v919_v60 = vld [vmem:[%s2832_s3 + $0x38] sm:$0xff]  ;;  %v920_v61 = vld [vmem:[%s2832_s3 + $0x40] sm:$0xff] }
  0xf7   :  { %v1937_v63 = vpop.f32.mrb[16].mxu1 }
  0xf8   :  { %v406_v0 = vpop.f32.mrb[17].mxu1 }
  0xf9   :  { %v2141_v1 = vpack.c.bf16 %v1937_v63, %v406_v0 }
  0xfb   :  { %v1940_v2 = vpop.f32.mrb[18].mxu1 }
  0xfc   :  { %2134 = vmatpush3.bf16.xpose.msk.msra.mxu1 %vm2487_vm1, %v2129_v59  ;;  %v416_v3 = vpop.f32.mrb[19].mxu1 }
  0xfd   :  { %2137 = vmatprep.subr.msk.bf16.mxu1 %vm2487_vm1, %v2135_v62  ;;  %v2147_v4 = vpack.c.bf16 %v1940_v2, %v416_v3 }
  0xff   :  { %v1943_v5 = vpop.f32.mrb[20].mxu1 }
 0x100   :  { %v426_v6 = vpop.f32.mrb[21].mxu1 }
 0x101   :  { %v2153_v7 = vpack.c.bf16 %v1943_v5, %v426_v6  ;;  %v922_v5 = vld [vmem:[%s2832_s3 + $0x50] sm:$0xff] }
 0x103   :  { %v1946_v8 = vpop.f32.mrb[22].mxu1 }
 0x104   :  { %2140 = vmatpush3.bf16.xpose.msk.msra.mxu1 %vm2487_vm1, %v2135_v62  ;;  %v436_v9 = vpop.f32.mrb[23].mxu1 }
 0x105   :  { %2143 = vmatprep.subr.msk.bf16.mxu1 %vm2487_vm1, %v2141_v1  ;;  %v2159_v10 = vpack.c.bf16 %v1946_v8, %v436_v9 }
 0x10c   :  { %2146 = vmatpush3.bf16.xpose.msk.msra.mxu1 %vm2487_vm1, %v2141_v1 }
 0x10d   :  { %2149 = vmatprep.subr.msk.bf16.mxu1 %vm2487_vm1, %v2147_v4 }
 0x114   :  { %2152 = vmatpush3.bf16.xpose.msk.msra.mxu1 %vm2487_vm1, %v2147_v4  ;;  %v921_v4 = vld [vmem:[%s2832_s3 + $0x48] sm:$0xff] }
 0x115   :  { %2155 = vmatprep.subr.msk.bf16.mxu1 %vm2487_vm1, %v2153_v7 }
 0x11c   :  { %2158 = vmatpush3.bf16.xpose.msk.msra.mxu1 %vm2487_vm1, %v2153_v7 }
 0x11d   :  { %2161 = vmatprep.subr.msk.bf16.mxu1 %vm2487_vm1, %v2159_v10 }
 0x124   :  { %2164 = vmatpush3.bf16.xpose.msk.msra.mxu1 %vm2487_vm1, %v2159_v10 }
 0x12b   :  { %2006 = vmatmul.mubr.msk.f32.vlgmr.msra.gmra.mrb[24].mxu1 %vm41_vm0, %v1899_v38 }
 0x12c   :  { %2008 = vmatprep.mubr.msk.f32.mxu1 %vm41_vm0, %v166_v44  ;;  %v915_v44 = vld [vmem:[%s2832_s3 + $0x18] sm:$0xff] }
 0x12f   :  { %2009 = vmatmul.mubr.msk.f32.gmra.mrb[26].mxu1 %vm41_vm0, %v1902_v42 }
 0x130   :  { %2011 = vmatprep.mubr.msk.f32.mxu1 %vm41_vm0, %v176_v48 }
 0x133   :  { %2012 = vmatmul.mubr.msk.f32.gmra.mrb[28].mxu1 %vm41_vm0, %v1905_v46 }
 0x134   :  { %2014 = vmatprep.mubr.msk.f32.mxu1 %vm41_vm0, %v186_v54 }
 0x137   :  { %2015 = vmatmul.mubr.msk.f32.gmra.mrb[30].mxu1 %vm41_vm0, %v1908_v52  ;;  %v917_v52 = vld [vmem:[%s2832_s3 + $0x28] sm:$0xff] }
 0x138   :  { %2017 = vmatprep.mubr.msk.f32.mxu1 %vm41_vm0, %v2476_v35 }
 0x13b   :  { %2018 = vmatmul.mubr.msk.f32.gmra.mrb[32].mxu1 %vm41_vm0, %v2474_v34 }
 0x13c   :  { %2020 = vmatprep.mubr.msk.f32.mxu1 %vm41_vm0, %v2480_v37  ;;  %v914_v37 = vld [vmem:[%s2832_s3 + $0x10] sm:$0xff] }
 0x13f   :  { %2021 = vmatmul.mubr.msk.f32.gmra.mrb[34].mxu1 %vm41_vm0, %v2478_v36  ;;  %v913_v36 = vld [vmem:[%s2832_s3 + $0x8] sm:$0xff] }
 0x140   :  { %2023 = vmatprep.mubr.msk.f32.mxu1 %vm41_vm0, %v216_v41 }
 0x143   :  { %2024 = vmatmul.mubr.msk.f32.gmra.mrb[36].mxu1 %vm41_vm0, %v2482_v39 }
 0x144   :  { %2026 = vmatprep.mubr.msk.f32.mxu1 %vm41_vm0, %v226_v45  ;;  %v916_v45 = vld [vmem:[%s2832_s3 + $0x20] sm:$0xff] }
 0x147   :  { %2027 = vmatmul.mubr.msk.f32.gmra.mrb[38].mxu1 %vm41_vm0, %v1920_v43 }
 0x1fe   :  { %v2007_v28 = vpop.f32.mrb[24].mxu1 }
 0x1ff   :  { %v817_v29 = vpop.f32.mrb[25].mxu1  ;;  %v897_v32 = vmul.f32 0.17677669, %v2007_v28  ;;  %v1951_v28 = vpop.f32.mrb[8].mxu0 }
 0x200   :  { %v896_v31 = vmul.f32 0.17677669, %v817_v29  ;;  %v576_v29 = vpop.f32.mrb[9].mxu0 }
 0x201   :  { %v2622_v41 = vadd.f32 %v913_v36, %v897_v32 }
 0x202   :  { %v2010_v33 = vpop.f32.mrb[26].mxu1  ;;  %v2613_v34 = vadd.f32 %v912_v30, %v896_v31  ;;  %v2165_v30 = vpack.c.bf16 %v1951_v28, %v576_v29  ;;  %v1954_v31 = vpop.f32.mrb[10].mxu0 }
 0x203   :  { %v827_v35 = vpop.f32.mrb[27].mxu1  ;;  %v899_v39 = vmul.f32 0.17677669, %v2010_v33  ;;  %v586_v32 = vpop.f32.mrb[11].mxu0 }
 0x204   :  { %v898_v38 = vmul.f32 0.17677669, %v827_v35  ;;  %944 = vmax.xlane.f32.xlu0 %v2613_v34  ;;  %2166 = vmatprep.subr.bf16.mxu0 %v2165_v30  ;;  %v2169_v33 = vpack.c.bf16 %v1954_v31, %v586_v32  ;;  %v1957_v35 = vpop.f32.mrb[12].mxu0 }
 0x205   :  { %v2634_v49 = vadd.f32 %v915_v44, %v899_v39  ;;  %2168 = vmatpush3.bf16.msra.mxu0 %v2165_v30  ;;  %v596_v36 = vpop.f32.mrb[13].mxu0 }
 0x206   :  { %v2013_v40 = vpop.f32.mrb[28].mxu1  ;;  %v2624_v42 = vadd.f32 %v914_v37, %v898_v38  ;;  %2170 = vmatprep.subr.bf16.mxu0 %v2169_v33  ;;  %v2173_v37 = vpack.c.bf16 %v1957_v35, %v596_v36  ;;  %v1960_v38 = vpop.f32.mrb[14].mxu0 }
 0x207   :  { %v837_v43 = vpop.f32.mrb[29].mxu1  ;;  %v901_v47 = vmul.f32 0.17677669, %v2013_v40  ;;  %v606_v39 = vpop.f32.mrb[15].mxu0 }
 0x208   :  { %v900_v46 = vmul.f32 0.17677669, %v837_v43  ;;  %946 = vmax.xlane.f32.xlu0 %v2622_v41  ;;  %948 = vmax.xlane.f32.xlu1 %v2624_v42  ;;  %v2177_v40 = vpack.c.bf16 %v1960_v38, %v606_v39  ;;  %v1963_v43 = vpop.f32.mrb[16].mxu0 }
 0x209   :  { %v2646_v57 = vadd.f32 %v917_v52, %v901_v47  ;;  %2172 = vmatpush3.bf16.msra.mxu0 %v2169_v33  ;;  %v616_v44 = vpop.f32.mrb[17].mxu0 }
 0x20a   :  { %v2016_v48 = vpop.f32.mrb[30].mxu1  ;;  %v2636_v50 = vadd.f32 %v916_v45, %v900_v46  ;;  %2174 = vmatprep.subr.bf16.mxu0 %v2173_v37  ;;  %v2181_v45 = vpack.c.bf16 %v1963_v43, %v616_v44 }
 0x20b   :  { %v847_v51 = vpop.f32.mrb[31].mxu1  ;;  %v903_v55 = vmul.f32 0.17677669, %v2016_v48 }
 0x20c   :  { %v902_v54 = vmul.f32 0.17677669, %v847_v51  ;;  %950 = vmax.xlane.f32.xlu1 %v2634_v49  ;;  %952 = vmax.xlane.f32.xlu0 %v2636_v50 }
 0x20d   :  { %v2658_v1 = vadd.f32 %v919_v60, %v903_v55  ;;  %2176 = vmatpush3.bf16.msra.mxu0 %v2173_v37 }
 0x20e   :  { %v2019_v56 = vpop.f32.mrb[32].mxu1  ;;  %v2648_v58 = vadd.f32 %v918_v53, %v902_v54  ;;  %2178 = vmatprep.subr.bf16.mxu0 %v2177_v40 }
 0x20f   :  { %v857_v59 = vpop.f32.mrb[33].mxu1  ;;  %v905_v63 = vmul.f32 0.17677669, %v2019_v56 }
 0x210   :  { %v904_v62 = vmul.f32 0.17677669, %v857_v59  ;;  %954 = vmax.xlane.f32.xlu1 %v2646_v57  ;;  %956 = vmax.xlane.f32.xlu0 %v2648_v58 }
 0x211   :  { %v2670_v9 = vadd.f32 %v921_v4, %v905_v63  ;;  %2180 = vmatpush3.bf16.msra.mxu0 %v2177_v40 }
 0x212   :  { %v2022_v0 = vpop.f32.mrb[34].mxu1  ;;  %v2660_v2 = vadd.f32 %v920_v61, %v904_v62  ;;  %2182 = vmatprep.subr.bf16.mxu0 %v2181_v45 }
 0x213   :  { %v867_v3 = vpop.f32.mrb[35].mxu1  ;;  %v907_v7 = vmul.f32 0.17677669, %v2022_v0 }
 0x214   :  { %v906_v6 = vmul.f32 0.17677669, %v867_v3  ;;  %958 = vmax.xlane.f32.xlu1 %v2658_v1  ;;  %960 = vmax.xlane.f32.xlu0 %v2660_v2 }
 0x215   :  { %v2682_v17 = vadd.f32 %v923_v12, %v907_v7  ;;  %2184 = vmatpush3.bf16.msra.mxu0 %v2181_v45 }
 0x216   :  { %v2025_v8 = vpop.f32.mrb[36].mxu1  ;;  %v2672_v10 = vadd.f32 %v922_v5, %v906_v6 }
 0x217   :  { %v877_v11 = vpop.f32.mrb[37].mxu1  ;;  %v909_v15 = vmul.f32 0.17677669, %v2025_v8 }
 0x218   :  { %v908_v14 = vmul.f32 0.17677669, %v877_v11  ;;  %962 = vmax.xlane.f32.xlu1 %v2670_v9  ;;  %964 = vmax.xlane.f32.xlu0 %v2672_v10 }
 0x219   :  { %v2694_v24 = vadd.f32 %v925_v20, %v909_v15 }
 0x21a   :  { %v2028_v16 = vpop.f32.mrb[38].mxu1  ;;  %v2684_v18 = vadd.f32 %v924_v13, %v908_v14 }
 0x21b   :  { %v887_v19 = vpop.f32.mrb[39].mxu1  ;;  %v911_v23 = vmul.f32 0.17677669, %v2028_v16 }
 0x21c   :  { %v910_v22 = vmul.f32 0.17677669, %v887_v19  ;;  %966 = vmax.xlane.f32.xlu1 %v2682_v17  ;;  %968 = vmax.xlane.f32.xlu0 %v2684_v18 }
 0x21d   :  { %v2703_v27 = vadd.f32 %v927_v26, %v911_v23 }
 0x21e   :  { %v2696_v25 = vadd.f32 %v926_v21, %v910_v22 }
 0x220   :  { %970 = vmax.xlane.f32.xlu1 %v2694_v24  ;;  %972 = vmax.xlane.f32.xlu0 %v2696_v25 }
 0x224   :  { %974 = vmax.xlane.f32.xlu1 %v2703_v27 }
 0x291   :  { %v945_v46 = vpop.xlane.xlu0 %944 }
 0x292   :  { %v976_v47 = vsub.f32 %v2613_v34, %v945_v46 }
 0x294   :  { %v992_v48 = vmul.f32 1.442695, %v976_v47 }
 0x295   :  { %v947_v51 = vpop.xlane.xlu0 %946  ;;  %v949_v52 = vpop.xlane.xlu1 %948 }
 0x296   :  { %2214 = vpow2.f32 %v992_v48  ;;  %v977_v53 = vsub.f32 %v2622_v41, %v947_v51  ;;  %v978_v54 = vsub.f32 %v2624_v42, %v949_v52 }
 0x298   :  { %v994_v55 = vmul.f32 1.442695, %v977_v53  ;;  %v996_v56 = vmul.f32 1.442695, %v978_v54 }
 0x299   :  { %v951_v59 = vpop.xlane.xlu1 %950  ;;  %v953_v60 = vpop.xlane.xlu0 %952 }
 0x29a   :  { %2216 = vpow2.f32 %v994_v55  ;;  %v979_v61 = vsub.f32 %v2634_v49, %v951_v59  ;;  %v980_v62 = vsub.f32 %v2636_v50, %v953_v60  ;;  %v1234_v59 = vld [vmem:[%s2834_s5 + $0x8] sm:$0xff] }
 0x29b   :  { %2218 = vpow2.f32 %v996_v56 }
 0x29c   :  { %v998_v63 = vmul.f32 1.442695, %v979_v61  ;;  %v1000_v34 = vmul.f32 1.442695, %v980_v62 }
 0x29d   :  { %v955_v0 = vpop.xlane.xlu1 %954  ;;  %v957_v3 = vpop.xlane.xlu0 %956 }
 0x29e   :  { %2220 = vpow2.f32 %v998_v63  ;;  %v981_v4 = vsub.f32 %v2646_v57, %v955_v0  ;;  %v982_v41 = vsub.f32 %v2648_v58, %v957_v3 }
 0x29f   :  { %2222 = vpow2.f32 %v1000_v34 }
 0x2a0   :  { %v2713_v42 = vpop.eup %2214  ;;  %v1002_v5 = vmul.f32 1.442695, %v981_v4  ;;  %v1004_v6 = vmul.f32 1.442695, %v982_v41 }
 0x2a1   :  { %v959_v7 = vpop.xlane.xlu1 %958  ;;  %v961_v8 = vpop.xlane.xlu0 %960  ;;  %1024 = vadd.xlane.f32.xlu0 %v2713_v42 }
 0x2a2   :  { %2224 = vpow2.f32 %v1002_v5  ;;  %v983_v49 = vsub.f32 %v2658_v1, %v959_v7  ;;  %v984_v50 = vsub.f32 %v2660_v2, %v961_v8 }
 0x2a3   :  { %2226 = vpow2.f32 %v1004_v6 }
 0x2a4   :  { %v2718_v11 = vpop.eup %2216  ;;  %v1006_v57 = vmul.f32 1.442695, %v983_v49  ;;  %v1008_v12 = vmul.f32 1.442695, %v984_v50 }
 0x2a5   :  { %v2720_v58 = vpop.eup %2218  ;;  %v963_v13 = vpop.xlane.xlu1 %962  ;;  %1026 = vadd.xlane.f32.xlu1 %v2718_v11 }
 0x2a6   :  { %v965_v14 = vpop.xlane.xlu0 %964  ;;  %2228 = vpow2.f32 %v1006_v57  ;;  %v985_v15 = vsub.f32 %v2670_v9, %v963_v13  ;;  %1028 = vadd.xlane.f32.xlu0 %v2720_v58 }
 0x2a7   :  { %v986_v16 = vsub.f32 %v2672_v10, %v965_v14  ;;  %2230 = vpow2.f32 %v1008_v12 }
 0x2a8   :  { %v2726_v1 = vpop.eup %2220  ;;  %v1010_v2 = vmul.f32 1.442695, %v985_v15 }
 0x2a9   :  { %v1012_v19 = vmul.f32 1.442695, %v986_v16  ;;  %v2728_v20 = vpop.eup %2222  ;;  %v967_v21 = vpop.xlane.xlu1 %966  ;;  %1030 = vadd.xlane.f32.xlu1 %v2726_v1 }
 0x2aa   :  { %v969_v22 = vpop.xlane.xlu0 %968  ;;  %2232 = vpow2.f32 %v1010_v2  ;;  %v987_v23 = vsub.f32 %v2682_v17, %v967_v21  ;;  %1032 = vadd.xlane.f32.xlu0 %v2728_v20 }
 0x2ab   :  { %v988_v9 = vsub.f32 %v2684_v18, %v969_v22  ;;  %2234 = vpow2.f32 %v1012_v19  ;;  %v1966_v18 = vpop.f32.mrb[18].mxu0 }
 0x2ac   :  { %v2734_v10 = vpop.eup %2224  ;;  %v1014_v26 = vmul.f32 1.442695, %v987_v23  ;;  %v626_v37 = vpop.f32.mrb[19].mxu0 }
 0x2ad   :  { %v1016_v28 = vmul.f32 1.442695, %v988_v9  ;;  %v2736_v29 = vpop.eup %2226  ;;  %v971_v30 = vpop.xlane.xlu1 %970  ;;  %1034 = vadd.xlane.f32.xlu1 %v2734_v10  ;;  %v2185_v40 = vpack.c.bf16 %v1966_v18, %v626_v37 }
 0x2ae   :  { %v973_v31 = vpop.xlane.xlu0 %972  ;;  %2236 = vpow2.f32 %v1014_v26  ;;  %v989_v32 = vsub.f32 %v2694_v24, %v971_v30  ;;  %1036 = vadd.xlane.f32.xlu0 %v2736_v29 }
 0x2af   :  { %v990_v17 = vsub.f32 %v2696_v25, %v973_v31  ;;  %2238 = vpow2.f32 %v1016_v28  ;;  %v1969_v25 = vpop.f32.mrb[20].mxu0  ;;  %2186 = vmatprep.subr.bf16.mxu0 %v2185_v40 }
 0x2b0   :  { %v2742_v33 = vpop.eup %2228  ;;  %v1018_v35 = vmul.f32 1.442695, %v989_v32  ;;  %v636_v45 = vpop.f32.mrb[21].mxu0  ;;  %2188 = vmatpush3.bf16.msra.mxu0 %v2185_v40 }
 0x2b1   :  { %v1020_v36 = vmul.f32 1.442695, %v990_v17  ;;  %v2744_v38 = vpop.eup %2230  ;;  %1038 = vadd.xlane.f32.xlu1 %v2742_v33  ;;  %v975_v39 = vpop.xlane.xlu1 %974  ;;  %v2189_v47 = vpack.c.bf16 %v1969_v25, %v636_v45 }
 0x2b2   :  { %2240 = vpow2.f32 %v1018_v35  ;;  %v991_v24 = vsub.f32 %v2703_v27, %v975_v39  ;;  %1040 = vadd.xlane.f32.xlu0 %v2744_v38  ;;  %v1972_v48 = vpop.f32.mrb[22].mxu0 }
 0x2b3   :  { %2242 = vpow2.f32 %v1020_v36  ;;  %2190 = vmatprep.subr.bf16.mxu0 %v2189_v47  ;;  %v646_v51 = vpop.f32.mrb[23].mxu0 }
 0x2b4   :  { %v2749_v43 = vpop.eup %2232  ;;  %v1022_v44 = vmul.f32 1.442695, %v991_v24  ;;  %2192 = vmatpush3.bf16.msra.mxu0 %v2189_v47  ;;  %v2193_v53 = vpack.c.bf16 %v1972_v48, %v646_v51  ;;  %v1233_v24 = vld [vmem:[%s2834_s5] sm:$0xff]  ;;  %v1429_v48 = vld [vmem:[%s2834_s5 + $0x10] sm:$0xff] }
 0x2b5   :  { %v2751_v46 = vpop.eup %2234  ;;  %1042 = vadd.xlane.f32.xlu1 %v2749_v43 }
 0x2b6   :  { %2244 = vpow2.f32 %v1022_v44  ;;  %1044 = vadd.xlane.f32.xlu0 %v2751_v46  ;;  %2194 = vmatprep.subr.bf16.mxu0 %v2193_v53 }
 0x2b8   :  { %v2755_v27 = vpop.eup %2236  ;;  %2196 = vmatpush3.bf16.msra.mxu0 %v2193_v53 }
 0x2b9   :  { %v2757_v52 = vpop.eup %2238  ;;  %1046 = vadd.xlane.f32.xlu1 %v2755_v27  ;;  %2085 = vmatprep.subr.mxu0 %v1234_v59 }
 0x2ba   :  { %1048 = vadd.xlane.f32.xlu0 %v2757_v52 }
 0x2bc   :  { %v2761_v54 = vpop.eup %2240 }
 0x2bd   :  { %v2763_v55 = vpop.eup %2242  ;;  %1050 = vadd.xlane.f32.xlu1 %v2761_v54 }
 0x2be   :  { %1052 = vadd.xlane.f32.xlu0 %v2763_v55 }
 0x2c0   :  { %v2767_v56 = vpop.eup %2244 }
 0x2c1   :  { %1054 = vadd.xlane.f32.xlu1 %v2767_v56 }
 0x32e   :  { %v1025_v60 = vpop.xlane.xlu0 %1024 }
 0x32f   :  { %2246 = vrcp.f32 %v1025_v60 }
 0x332   :  { %v1027_v61 = vpop.xlane.xlu1 %1026 }
 0x333   :  { %2248 = vrcp.f32 %v1027_v61  ;;  %v1029_v62 = vpop.xlane.xlu0 %1028 }
 0x334   :  { %2250 = vrcp.f32 %v1029_v62 }
 0x336   :  { %v1031_v63 = vpop.xlane.xlu1 %1030 }
 0x337   :  { %2252 = vrcp.f32 %v1031_v63  ;;  %v1033_v34 = vpop.xlane.xlu0 %1032  ;;  %v1759_v63 = vld [vmem:[%s2834_s5 + $0x20] ss:$0 sm:$0xff] }
 0x338   :  { %2254 = vrcp.f32 %v1033_v34 }
 0x339   :  { %v2247_v0 = vpop.eup %2246 }
 0x33a   :  { %v1035_v3 = vpop.xlane.xlu1 %1034  ;;  %v1057_v4 = vmul.f32 %v2247_v0, %v2713_v42 }
 0x33b   :  { %2256 = vrcp.f32 %v1035_v3  ;;  %v1037_v41 = vpop.xlane.xlu0 %1036 }
 0x33c   :  { %2258 = vrcp.f32 %v1037_v41  ;;  %2061 = vmatprep.mubr.f32.mxu0 %v1057_v4 }
 0x33d   :  { %v2249_v5 = vpop.eup %2248 }
 0x33e   :  { %v2251_v6 = vpop.eup %2250  ;;  %v1059_v7 = vmul.f32 %v2249_v5, %v2718_v11  ;;  %v1039_v8 = vpop.xlane.xlu1 %1038 }
 0x33f   :  { %2260 = vrcp.f32 %v1039_v8  ;;  %v1041_v49 = vpop.xlane.xlu0 %1040  ;;  %v1061_v50 = vmul.f32 %v2251_v6, %v2720_v58 }
 0x340   :  { %2262 = vrcp.f32 %v1041_v49  ;;  %2062 = vmatmul.mubr.f32.vlgmr.msra.gmra.mrb[24].mxu0 %v1059_v7 }
 0x341   :  { %v2253_v57 = vpop.eup %2252  ;;  %2064 = vmatprep.mubr.f32.mxu0 %v1061_v50  ;;  %2086 = vmatpush3.msra.mxu0 %v1234_v59 }
 0x342   :  { %v2255_v12 = vpop.eup %2254  ;;  %v1043_v42 = vpop.xlane.xlu1 %1042  ;;  %v1063_v13 = vmul.f32 %v2253_v57, %v2726_v1  ;;  %2093 = vmatprep.subr.mxu0 %v1233_v24 }
 0x343   :  { %2264 = vrcp.f32 %v1043_v42  ;;  %v1045_v14 = vpop.xlane.xlu0 %1044  ;;  %v1065_v15 = vmul.f32 %v2255_v12, %v2728_v20 }
 0x344   :  { %2266 = vrcp.f32 %v1045_v14  ;;  %2065 = vmatmul.mubr.f32.gmra.mrb[26].mxu0 %v1063_v13 }
 0x345   :  { %v2257_v11 = vpop.eup %2256  ;;  %2067 = vmatprep.mubr.f32.mxu0 %v1065_v15 }
 0x346   :  { %v2259_v16 = vpop.eup %2258  ;;  %v1047_v2 = vpop.xlane.xlu1 %1046  ;;  %v1067_v58 = vmul.f32 %v2257_v11, %v2734_v10 }
 0x347   :  { %2268 = vrcp.f32 %v1047_v2  ;;  %v1049_v19 = vpop.xlane.xlu0 %1048  ;;  %v1069_v21 = vmul.f32 %v2259_v16, %v2736_v29 }
 0x348   :  { %2270 = vrcp.f32 %v1049_v19  ;;  %2068 = vmatmul.mubr.f32.gmra.mrb[28].mxu0 %v1067_v58 }
 0x349   :  { %v2261_v22 = vpop.eup %2260  ;;  %2070 = vmatprep.mubr.f32.mxu0 %v1069_v21 }
 0x34a   :  { %v2263_v1 = vpop.eup %2262  ;;  %v1051_v23 = vpop.xlane.xlu1 %1050  ;;  %v1071_v20 = vmul.f32 %v2261_v22, %v2742_v33 }
 0x34b   :  { %2272 = vrcp.f32 %v1051_v23  ;;  %v1053_v9 = vpop.xlane.xlu0 %1052  ;;  %v1073_v26 = vmul.f32 %v2263_v1, %v2744_v38 }
 0x34c   :  { %2274 = vrcp.f32 %v1053_v9  ;;  %2071 = vmatmul.mubr.f32.gmra.mrb[30].mxu0 %v1071_v20 }
 0x34d   :  { %v2265_v28 = vpop.eup %2264  ;;  %2073 = vmatprep.mubr.f32.mxu0 %v1073_v26 }
 0x34e   :  { %v2267_v10 = vpop.eup %2266  ;;  %v1055_v30 = vpop.xlane.xlu1 %1054  ;;  %v1075_v29 = vmul.f32 %v2265_v28, %v2749_v43 }
 0x34f   :  { %2276 = vrcp.f32 %v1055_v30  ;;  %v1077_v31 = vmul.f32 %v2267_v10, %v2751_v46 }
 0x350   :  { %2074 = vmatmul.mubr.f32.gmra.mrb[32].mxu0 %v1075_v29 }
 0x351   :  { %v2269_v32 = vpop.eup %2268  ;;  %2076 = vmatprep.mubr.f32.mxu0 %v1077_v31 }
 0x352   :  { %v2271_v17 = vpop.eup %2270  ;;  %v1079_v18 = vmul.f32 %v2269_v32, %v2755_v27 }
 0x353   :  { %v1081_v33 = vmul.f32 %v2271_v17, %v2757_v52 }
 0x354   :  { %2077 = vmatmul.mubr.f32.gmra.mrb[34].mxu0 %v1079_v18 }
 0x355   :  { %v2273_v35 = vpop.eup %2272  ;;  %2079 = vmatprep.mubr.f32.mxu0 %v1081_v33 }
 0x356   :  { %v2275_v36 = vpop.eup %2274  ;;  %v1083_v37 = vmul.f32 %v2273_v35, %v2761_v54  ;;  %v1531_v54 = vld [vmem:[%s2834_s5 + $0x18] sm:$0xff] }
 0x357   :  { %v1085_v38 = vmul.f32 %v2275_v36, %v2763_v55 }
 0x358   :  { %2080 = vmatmul.mubr.f32.gmra.mrb[36].mxu0 %v1083_v37 }
 0x359   :  { %v2277_v39 = vpop.eup %2276  ;;  %2082 = vmatprep.mubr.f32.mxu0 %v1085_v38 }
 0x35a   :  { %v1087_v40 = vmul.f32 %v2277_v39, %v2767_v56 }
 0x35c   :  { %2083 = vmatmul.mubr.f32.gmra.mrb[38].mxu0 %v1087_v40 }
 0x413   :  { %v2063_v25 = vpop.f32.mrb[24].mxu0 }
 0x414   :  { %v1154_v43 = vpop.f32.mrb[25].mxu0 }
 0x417   :  { %v2066_v44 = vpop.f32.mrb[26].mxu0 }
 0x418   :  { %v1164_v45 = vpop.f32.mrb[27].mxu0 }
 0x41b   :  { %v2069_v46 = vpop.f32.mrb[28].mxu0 }
 0x41c   :  { %v1174_v47 = vpop.f32.mrb[29].mxu0 }
 0x41d   :  { %2087 = vmatprep.mubr.msk.f32.mxu0 %vm41_vm0, %v1174_v47 }
 0x41e   :  { %2088 = vmatmul.mubr.msk.f32.vlgmr.msra.gmra.mrb[40].mxu0 %vm41_vm0, %v2069_v46 }
 0x41f   :  { %v2072_v27 = vpop.f32.mrb[30].mxu0  ;;  %2094 = vmatpush3.msra.mxu0 %v1233_v24 }
 0x420   :  { %v1184_v51 = vpop.f32.mrb[31].mxu0  ;;  %2101 = vmatprep.subr.mxu0 %v1429_v48 }
 0x421   :  { %2090 = vmatprep.mubr.msk.f32.mxu0 %vm41_vm0, %v1184_v51 }
 0x422   :  { %2091 = vmatmul.mubr.msk.f32.gmra.mrb[42].mxu0 %vm41_vm0, %v2072_v27 }
 0x423   :  { %v2075_v52 = vpop.f32.mrb[32].mxu0  ;;  %2095 = vmatprep.mubr.msk.f32.mxu0 %vm41_vm0, %v1154_v43 }
 0x424   :  { %v1194_v53 = vpop.f32.mrb[33].mxu0 }
 0x426   :  { %2096 = vmatmul.mubr.msk.f32.vlgmr.msra.gmra.mrb[40].mxu0 %vm41_vm0, %v2063_v25 }
 0x427   :  { %v2078_v55 = vpop.f32.mrb[34].mxu0  ;;  %2098 = vmatprep.mubr.msk.f32.mxu0 %vm41_vm0, %v1164_v45  ;;  %2102 = vmatpush3.msra.mxu0 %v1429_v48 }
 0x428   :  { %v1204_v56 = vpop.f32.mrb[35].mxu0  ;;  %2109 = vmatprep.subr.mxu0 %v1531_v54 }
 0x42a   :  { %2099 = vmatmul.mubr.msk.f32.gmra.mrb[42].mxu0 %vm41_vm0, %v2066_v44 }
 0x42b   :  { %v2081_v59 = vpop.f32.mrb[36].mxu0  ;;  %2103 = vmatprep.mubr.msk.f32.mxu0 %vm41_vm0, %v1194_v53 }
 0x42c   :  { %v1214_v60 = vpop.f32.mrb[37].mxu0 }
 0x42e   :  { %2104 = vmatmul.mubr.msk.f32.vlgmr.msra.gmra.mrb[40].mxu0 %vm41_vm0, %v2075_v52 }
 0x42f   :  { %v2084_v61 = vpop.f32.mrb[38].mxu0  ;;  %2106 = vmatprep.mubr.msk.f32.mxu0 %vm41_vm0, %v1204_v56  ;;  %2110 = vmatpush3.msra.mxu0 %v1531_v54 }
 0x430   :  { %v1224_v62 = vpop.f32.mrb[39].mxu0 }
 0x432   :  { %2107 = vmatmul.mubr.msk.f32.gmra.mrb[42].mxu0 %vm41_vm0, %v2078_v55 }
 0x433   :  { %2111 = vmatprep.mubr.msk.f32.mxu0 %vm41_vm0, %v1214_v60 }
 0x436   :  { %2112 = vmatmul.mubr.msk.f32.vlgmr.msra.gmra.mrb[40].mxu0 %vm41_vm0, %v2081_v59 }
 0x437   :  { %2114 = vmatprep.mubr.msk.f32.mxu0 %vm41_vm0, %v1224_v62 }
 0x43a   :  { %2115 = vmatmul.mubr.msk.f32.gmra.mrb[42].mxu0 %vm41_vm0, %v2084_v61 }
 0x509   :  { %v2113_v34 = vpop.f32.mrb[40].mxu0 }
 0x50a   :  { %v1639_v0 = vadd.f32 %v2113_v34, %v1759_v63  ;;  %v1610_v3 = vpop.f32.mrb[41].mxu0 }
 0x50b   :  { %v1638_v4 = vadd.f32 %v1759_v63, %v1610_v3 }
 0x50c   :  { %1644 = vst.msk [vmem:[#allocation2 + $0x8] sm:$0xff] %vm1642_vm2, %v1639_v0 }
 0x50d   :  { %1643 = vst.msk [vmem:[#allocation2] sm:$0xff] %vm1642_vm2, %v1638_v4  ;;  %v2116_v41 = vpop.f32.mrb[42].mxu0 }
 0x50e   :  { %v1641_v5 = vadd.f32 %v2116_v41, %v1759_v63  ;;  %v1620_v6 = vpop.f32.mrb[43].mxu0 }
 0x50f   :  { %v1640_v7 = vadd.f32 %v1759_v63, %v1620_v6 }
 0x510   :  { %1646 = vst.msk [vmem:[#allocation2 + $0x18] sm:$0xff] %vm1642_vm2, %v1641_v5 }
 0x511   :  { %1645 = vst.msk [vmem:[#allocation2 + $0x10] sm:$0xff] %vm1642_vm2, %v1640_v7 }
 0x512   :  { %2289 = shalt.err (!%p2286_p4)
}
 0x513   :  { %s2290_s12 = scalar_lea.hbm %s2835_s6, 512 }
 0x514   :  { %p2291_p5 = scmp.ne.s32.totalorder %s2835_s6, %s2290_s12  ;;  %p2294_p6 = scmp.lt.u32.totalorder %s2290_s12, %s2835_s6 }
 0x516   :  { %p2296_p7 = pnand %p2294_p6, %p2291_p5 }
 0x518   :  { %2299 = shalt.err (!%p2296_p7)
}
 0x519   :  { %s2303_s16 = smov 128   ;;  %s2304_s17 = smov 8  }
 0x51a   :  { %1658 = dma.vmem_to_hbm [thread:$0]  %s1653_s9, 512, %s2835_s6, [#allocation3], %s2303_s16, %s2303_s16, %s2304_s17  }
 0x51b   :  { %2300 = dma.done.wait [#allocation3], 512  }
 0x51c   :  { %2301 = vsyncadd [#allocation3], 4294966784 }
 0x51d   :  { %1662 = vsyncpa [#allocation3], 1 }

</bundles_post_ra>
